<compile_context>
chip_gen: v7x
topology: tpu7x:2x2x1
jax: 0.10.0
libtpu: 0.0.40
codegen_flags: <defaults>
</compile_context>

<pallas_src>
import jax
import jax.numpy as jnp
from jax.experimental import pallas as pl
from jax.experimental.pallas import tpu as pltpu


def bilinear_kernel(u_ref, v_ref, b_ref, o_ref):
    # u_ref, v_ref : (TB, D)  batch-major blocks, exactly as the XLA gather
    #                         produced them (no wrapper-side transpose pass).
    # b_ref        : (1, TB)  merged user+item bias, lane-dense, f32.
    # o_ref        : (8, TB)  lane-dense output rows (all 8 rows identical; the
    #                         wrapper keeps row 0).  8 rows = native sublane
    #                         tile, avoids an M=1 matmul; the extra output
    #                         traffic is ~D/8x smaller than one input stream.
    prod = u_ref[...] * v_ref[...]                           # (TB, D)  VPU
    ones = jnp.ones((8, u_ref.shape[1]), prod.dtype)
    # NT matmul (same dimension numbers as q @ k^T in flash attention):
    # contracts D of both operands, so the batch axis of `prod` lands on the
    # *lane* axis of the result -> reduction + sublane->lane relayout in a
    # single op on the otherwise idle MXU.
    dot = jax.lax.dot_general(
        ones, prod,
        dimension_numbers=(((1,), (1,)), ((), ())),
        preferred_element_type=jnp.float32)                  # (8, TB) f32
    logits = dot + b_ref[...]                                # bias broadcasts over sublanes
    o_ref[...] = jax.nn.sigmoid(logits).astype(o_ref.dtype)


def _round_up(x, m):
    return ((x + m - 1) // m) * m


def bilinear_forward(user_ids, item_ids, params, *, tb=4096, emb_dtype=None):
    """Pallas implementation of bilinear.forward.

    user_ids, item_ids: integer arrays, any shape (flattened like .view(-1))
    params: dict with user_emb_w (NU,D), item_emb_w (NI,D),
            user_bias_w (NU,1), item_bias_w (NI,1)
    emb_dtype: optional (e.g. jnp.bfloat16) to halve embedding DMA; the
               accumulation, biases and sigmoid stay float32.
    returns: float32 array of shape (B,)
    """
    user_ids = user_ids.reshape(-1).astype(jnp.int32)
    item_ids = item_ids.reshape(-1).astype(jnp.int32)
    b = user_ids.shape[0]
    d = params["user_emb_w"].shape[1]

    # --- batch tile: big (default 4096 lanes ~= 1 MiB/step of embedding data)
    # so the fixed per-grid-step cost is amortized; multiple of 128 so every
    # block is lane-aligned; >= 2 grid steps when possible so both v7x
    # TensorCores get work from the "parallel" grid axis.
    tb = max(128, _round_up(tb, 128))
    b128 = _round_up(b, 128)
    tb = min(tb, b128)
    if tb == b128 and b128 >= 256:
        tb = _round_up(b128 // 2, 128)
    b_pad = _round_up(b, tb)

    # Pad the (cheap) int32 id vectors with a valid index (0) before the
    # gather, so the gathered arrays come out already tile-aligned.
    if b_pad != b:
        pad = b_pad - b
        user_ids = jnp.pad(user_ids, (0, pad))
        item_ids = jnp.pad(item_ids, (0, pad))

    # --- glue: embedding gathers (nn.Embedding lookups).  Fed to the kernel
    # in gather order (B_pad, D) -- no XLA-side transpose materialization.
    user_emb = jnp.take(params["user_emb_w"], user_ids, axis=0)     # (B_pad, D)
    item_emb = jnp.take(params["item_emb_w"], item_ids, axis=0)     # (B_pad, D)
    if emb_dtype is not None:
        user_emb = user_emb.astype(emb_dtype)                       # fuses into gather
        item_emb = item_emb.astype(emb_dtype)
    # Merged bias: one lane-dense (1, B_pad) stream instead of two.
    bias = (jnp.take(params["user_bias_w"][:, 0], user_ids)
            + jnp.take(params["item_bias_w"][:, 0], item_ids))[None, :]   # (1, B_pad) f32

    grid = (b_pad // tb,)

    emb_bytes = 2 * b_pad * d * user_emb.dtype.itemsize
    bytes_accessed = emb_bytes + bias.size * 4 + 8 * b_pad * 4
    flops = b_pad * d * (1 + 2 * 8) + 8 * b_pad * 4          # mul + NT matmul + epilogue
    transcendentals = 8 * b_pad                               # sigmoid exp

    out = pl.pallas_call(
        bilinear_kernel,
        out_shape=jax.ShapeDtypeStruct((8, b_pad), jnp.float32),
        grid_spec=pltpu.PrefetchScalarGridSpec(
            num_scalar_prefetch=0,
            grid=grid,
            in_specs=[
                pl.BlockSpec((tb, d), lambda i: (i, 0)),   # user_emb (TB, D)
                pl.BlockSpec((tb, d), lambda i: (i, 0)),   # item_emb (TB, D)
                pl.BlockSpec((1, tb), lambda i: (0, i)),   # merged bias (1, TB)
            ],
            out_specs=pl.BlockSpec((8, tb), lambda i: (0, i)),
        ),
        compiler_params=pltpu.CompilerParams(
            dimension_semantics=("parallel",),
            vmem_limit_bytes=32 * 1024 * 1024,
        ),
        cost_estimate=pl.CostEstimate(
            flops=int(flops),
            transcendentals=int(transcendentals),
            bytes_accessed=int(bytes_accessed),
        ),
    )(user_emb, item_emb, bias)

    return out[0, :b]


def init_params(key, num_user, num_item, emb_dim):
    k_u, k_i, k_ub, k_ib = jax.random.split(key, 4)
    # ScaledEmbedding: normal(0, 1/emb_dim)
    user_emb_w = jax.random.normal(k_u, (num_user, emb_dim), jnp.float32) / emb_dim
    item_emb_w = jax.random.normal(k_i, (num_item, emb_dim), jnp.float32) / emb_dim
    # ZeroEmbedding init is zeros in the module; use small deterministic values
    # here so the bias-add path of the kernel is actually exercised.
    user_bias_w = 0.01 * jax.random.normal(k_ub, (num_user, 1), jnp.float32)
    item_bias_w = 0.01 * jax.random.normal(k_ib, (num_item, 1), jnp.float32)
    return {
        "user_emb_w": user_emb_w,
        "item_emb_w": item_emb_w,
        "user_bias_w": user_bias_w,
        "item_bias_w": item_bias_w,
    }


def reference_forward(user_ids, item_ids, params):
    user_ids = user_ids.reshape(-1)
    item_ids = item_ids.reshape(-1)
    ue = params["user_emb_w"][user_ids]
    ie = params["item_emb_w"][item_ids]
    ub = params["user_bias_w"][user_ids][:, 0]
    ib = params["item_bias_w"][item_ids][:, 0]
    dot = jnp.sum(ue * ie, axis=1)
    return jax.nn.sigmoid(dot + ub + ib)


if __name__ == "__main__":
    num_user, num_item, emb_dim = 10, 20, 32
    batch = 16

    key = jax.random.PRNGKey(0)
    k_params, k_uid, k_iid = jax.random.split(key, 3)
    params = init_params(k_params, num_user, num_item, emb_dim)

    user_ids = jax.random.randint(k_uid, (batch,), 0, num_user, dtype=jnp.int32)
    item_ids = jax.random.randint(k_iid, (batch,), 0, num_item, dtype=jnp.int32)

    out = bilinear_forward(user_ids, item_ids, params)
    out = jax.block_until_ready(out)

    ref = reference_forward(user_ids, item_ids, params)
    assert out.shape == (batch,)
    # Slightly loose tolerance: the D-reduction runs on the MXU, whose f32
    # accumulation order / internal passes differ marginally from jnp.sum.
    assert jnp.allclose(out, ref, atol=1e-4, rtol=1e-4), (out, ref)

    print("KERNEL_OK")
</pallas_src>

<mosaic_0001>
module attributes {stable_mosaic.version = 11 : i64} {
  func.func @bilinear_kernel(%arg0: i32, %arg1: memref<128x32xf32, #tpu.memory_space<vmem>>, %arg2: memref<128x32xf32, #tpu.memory_space<vmem>>, %arg3: memref<1x128xf32, #tpu.memory_space<vmem>>, %arg4: memref<8x128xf32, #tpu.memory_space<vmem>>) attributes {dimension_semantics = [#tpu.dimension_semantics<parallel>], iteration_bounds = array<i64: 1>, scalar_prefetch = 0 : i64, scratch_operands = 0 : i64, tpu.core_type = #tpu.core_type<tc>, window_params = [{transform_indices = @transform_0, window_bounds = array<i64: 128, 32>}, {transform_indices = @transform_1, window_bounds = array<i64: 128, 32>}, {transform_indices = @transform_2, window_bounds = array<i64: 1, 128>}, {transform_indices = @transform_3, window_bounds = array<i64: 8, 128>}]} {
    %c0 = arith.constant 0 : index
    %c0_0 = arith.constant 0 : index
    %0 = vector.load %arg1[%c0, %c0_0] : memref<128x32xf32, #tpu.memory_space<vmem>>, vector<128x32xf32>
    %c0_1 = arith.constant 0 : index
    %c0_2 = arith.constant 0 : index
    %1 = vector.load %arg2[%c0_1, %c0_2] : memref<128x32xf32, #tpu.memory_space<vmem>>, vector<128x32xf32>
    %2 = arith.mulf %0, %1 : vector<128x32xf32>
    %cst = arith.constant 1.000000e+00 : f32
    %3 = vector.broadcast %cst : f32 to vector<8x32xf32>
    %cst_3 = arith.constant dense<0.000000e+00> : vector<8x128xf32>
    %4 = tpu.matmul %3, %2, %cst_3 {dimension_numbers = #tpu.dot_dimension_numbers<[1], [1], [0], [0], [0, 0, 1, 0], [], []>} : vector<8x32xf32>, vector<128x32xf32>, vector<8x128xf32> -> vector<8x128xf32>
    %c0_4 = arith.constant 0 : index
    %c0_5 = arith.constant 0 : index
    %5 = vector.load %arg3[%c0_4, %c0_5] : memref<1x128xf32, #tpu.memory_space<vmem>>, vector<1x128xf32>
    %6 = vector.broadcast %5 : vector<1x128xf32> to vector<8x128xf32>
    %7 = arith.addf %4, %6 : vector<8x128xf32>
    %8 = arith.negf %7 : vector<8x128xf32>
    %9 = math.exp %8 : vector<8x128xf32>
    %cst_6 = arith.constant 1.000000e+00 : f32
    %10 = vector.broadcast %cst_6 : f32 to vector<8x128xf32>
    %11 = arith.addf %10, %9 : vector<8x128xf32>
    %12 = arith.divf %10, %11 : vector<8x128xf32>
    %c0_7 = arith.constant 0 : index
    %c0_8 = arith.constant 0 : index
    %13 = vector.load %arg4[%c0_7, %c0_8] : memref<8x128xf32, #tpu.memory_space<vmem>>, vector<8x128xf32>
    tpu.vector_store %arg4[%c0_7, %c0_8], %12 {strides = array<i32>} : memref<8x128xf32, #tpu.memory_space<vmem>>, vector<8x128xf32>,
    return
  }
  func.func @transform_0(%arg0: i32) -> (i32, i32) {
    %c0_i32 = arith.constant 0 : i32
    %c0_i32_0 = arith.constant 0 : i32
    return %arg0, %c0_i32 : i32, i32
  }
  func.func @transform_1(%arg0: i32) -> (i32, i32) {
    %c0_i32 = arith.constant 0 : i32
    %c0_i32_0 = arith.constant 0 : i32
    return %arg0, %c0_i32 : i32, i32
  }
  func.func @transform_2(%arg0: i32) -> (i32, i32) {
    %c0_i32 = arith.constant 0 : i32
    %c0_i32_0 = arith.constant 0 : i32
    return %c0_i32, %arg0 : i32, i32
  }
  func.func @transform_3(%arg0: i32) -> (i32, i32) {
    %c0_i32 = arith.constant 0 : i32
    %c0_i32_0 = arith.constant 0 : i32
    return %c0_i32, %arg0 : i32, i32
  }
}

</mosaic_0001>

<bundles_post_ra>
// kernel: tpu_custom_call.1
= control target key start
LH: loop header
LB: loop body
LE: loop exit
PB: predicated region body
PF: predicated region fallthrough
CT: control target
= control target key end

     0   :  { %vm70_vm0 = vcmask 261120   ;;  %v349_v3 = vmov 0.0|0.0   ;;  %vm350_vm2 = vmmov 0   ;;  %v351_v9 = vmov 0.0   ;;  %s516_s0 = inlined_call_operand.vmem [shape: f32[128,32], index: 0, kind: input, shape index: {}]   ;;  %s517_s1 = inlined_call_operand.vmem [shape: f32[128,32], index: 1, kind: input, shape index: {}]   ;;  %s518_s2 = inlined_call_operand.vmem [shape: f32[1,128], index: 2, kind: input, shape index: {}]   ;;  %s519_s3 = inlined_call_operand.hbm [shape: f32[8,128], index: 3, kind: output, shape index: {}]  }
   0x1   :  { %v15_v0 = vld [vmem:[%s516_s0] sm:$0xff]  ;;  %v16_v1 = vld [vmem:[%s516_s0 + $0x8] sm:$0xff]  ;;  %284 = vmatprep.subr.bf16.mxu0 %v349_v3  ;;  %vm389_vm1 = vmpackc.low %vm70_vm0, %vm70_vm0  ;;  %281 = vmatprep.mubr.msk.f32.mxu0 %vm350_vm2, %v351_v9 }
   0x2   :  { %v31_v2 = vld [vmem:[%s517_s1] sm:$0xff]  ;;  %v32_v4 = vld [vmem:[%s517_s1 + $0x8] sm:$0xff]  ;;  %v17_v8 = vld [vmem:[%s516_s0 + $0x10] sm:$0xff] }
   0x3   :  { %v47_v5 = vmul.f32 %v31_v2, %v15_v0  ;;  %v48_v6 = vmul.f32 %v32_v4, %v16_v1  ;;  %v18_v10 = vld [vmem:[%s516_s0 + $0x18] sm:$0xff]  ;;  %v33_v11 = vld [vmem:[%s517_s1 + $0x10] sm:$0xff]  ;;  %v19_v17 = vld [vmem:[%s516_s0 + $0x20] sm:$0xff] }
   0x4   :  { %v34_v12 = vld [vmem:[%s517_s1 + $0x18] sm:$0xff]  ;;  %v49_v14 = vmul.f32 %v33_v11, %v17_v8  ;;  %v20_v18 = vld [vmem:[%s516_s0 + $0x28] sm:$0xff]  ;;  %v35_v19 = vld [vmem:[%s517_s1 + $0x20] sm:$0xff] }
   0x5   :  { %v285_v13 = vpack.c.bf16 %v48_v6, %v47_v5  ;;  %v50_v15 = vmul.f32 %v34_v12, %v18_v10  ;;  %v36_v20 = vld [vmem:[%s517_s1 + $0x28] sm:$0xff] }
   0x7   :  { %287 = vmatpush3.bf16.xpose.msk.msra.mxu0 %vm389_vm1, %v285_v13  ;;  %v289_v16 = vpack.c.bf16 %v50_v15, %v49_v14 }
   0x8   :  { %288 = vmatprep.subr.bf16.mxu0 %v349_v3 }
   0x9   :  { %8 = vsyncpa [#allocation3], 0  ;;  %v51_v21 = vmul.f32 %v35_v19, %v19_v17  ;;  %v52_v22 = vmul.f32 %v36_v20, %v20_v18  ;;  %v21_v24 = vld [vmem:[%s516_s0 + $0x30] sm:$0xff]  ;;  %v22_v25 = vld [vmem:[%s516_s0 + $0x38] sm:$0xff]  ;;  %v352_v59 = vmov 1.0  }
   0xa   :  { %v37_v26 = vld [vmem:[%s517_s1 + $0x30] sm:$0xff]  ;;  %v38_v27 = vld [vmem:[%s517_s1 + $0x38] sm:$0xff]  ;;  %v23_v31 = vld [vmem:[%s516_s0 + $0x40] sm:$0xff] }
   0xb   :  { %v293_v23 = vpack.c.bf16 %v52_v22, %v51_v21  ;;  %v53_v28 = vmul.f32 %v37_v26, %v21_v24  ;;  %v54_v29 = vmul.f32 %v38_v27, %v22_v25  ;;  %v24_v32 = vld [vmem:[%s516_s0 + $0x48] sm:$0xff]  ;;  %v39_v33 = vld [vmem:[%s517_s1 + $0x40] sm:$0xff]  ;;  %v25_v38 = vld [vmem:[%s516_s0 + $0x50] sm:$0xff] }
   0xc   :  { %v40_v34 = vld [vmem:[%s517_s1 + $0x48] sm:$0xff]  ;;  %v55_v35 = vmul.f32 %v39_v33, %v23_v31  ;;  %v26_v39 = vld [vmem:[%s516_s0 + $0x58] sm:$0xff]  ;;  %v41_v40 = vld [vmem:[%s517_s1 + $0x50] sm:$0xff] }
   0xd   :  { %v297_v30 = vpack.c.bf16 %v54_v29, %v53_v28  ;;  %v56_v36 = vmul.f32 %v40_v34, %v24_v32  ;;  %v42_v41 = vld [vmem:[%s517_s1 + $0x58] sm:$0xff]  ;;  %v57_v42 = vmul.f32 %v41_v40, %v25_v38  ;;  %v27_v45 = vld [vmem:[%s516_s0 + $0x60] sm:$0xff]  ;;  %v28_v46 = vld [vmem:[%s516_s0 + $0x68] sm:$0xff] }
   0xe   :  { %v58_v43 = vmul.f32 %v42_v41, %v26_v39  ;;  %v43_v47 = vld [vmem:[%s517_s1 + $0x60] sm:$0xff]  ;;  %v44_v48 = vld [vmem:[%s517_s1 + $0x68] sm:$0xff]  ;;  %v29_v52 = vld [vmem:[%s516_s0 + $0x70] sm:$0xff] }
   0xf   :  { %291 = vmatpush3.bf16.xpose.msk.msra.mxu0 %vm389_vm1, %v289_v16  ;;  %v301_v37 = vpack.c.bf16 %v56_v36, %v55_v35  ;;  %v59_v49 = vmul.f32 %v43_v47, %v27_v45  ;;  %v60_v50 = vmul.f32 %v44_v48, %v28_v46  ;;  %v30_v53 = vld [vmem:[%s516_s0 + $0x78] sm:$0xff]  ;;  %v45_v54 = vld [vmem:[%s517_s1 + $0x70] sm:$0xff]  ;;  %v213_v60 = vld [vmem:[%s518_s2] ss:$0 sm:$0xff] }
  0x10   :  { %292 = vmatprep.subr.bf16.mxu0 %v349_v3  ;;  %v305_v44 = vpack.c.bf16 %v58_v43, %v57_v42  ;;  %v46_v55 = vld [vmem:[%s517_s1 + $0x78] sm:$0xff]  ;;  %v61_v56 = vmul.f32 %v45_v54, %v29_v52  ;;  %s353_s1 = smov [#allocation2]  }
  0x11   :  { %v309_v51 = vpack.c.bf16 %v60_v50, %v59_v49  ;;  %v62_v57 = vmul.f32 %v46_v55, %v30_v53  ;;  %s205_s23 = sshll.u32 %s353_s1, 4  ;;  %s206_s23 = int_to_ptr.vmem [resolvable:$true] %s205_s23 }
  0x12   :  { %s325_s24 = scalar_lea.vmem %s206_s23, 128  ;;  %p330_p1 = scmp.lt.s32.totalorder %s206_s23, %s206_s23 }
  0x13   :  { %v313_v58 = vpack.c.bf16 %v62_v57, %v61_v56  ;;  %p326_p0 = scmp.ne.s32.totalorder %s206_s23, %s325_s24  ;;  %p331_p2 = scmp.lt.s32.totalorder %s325_s24, %s325_s24 }
  0x15   :  { %p332_p3 = por %p331_p2, %p330_p1 }
  0x17   :  { %295 = vmatpush3.bf16.xpose.msk.msra.mxu0 %vm389_vm1, %v293_v23  ;;  %p333_p4 = pnand %p332_p3, %p326_p0 }
  0x18   :  { %296 = vmatprep.subr.bf16.mxu0 %v349_v3 }
  0x1f   :  { %299 = vmatpush3.bf16.xpose.msk.msra.mxu0 %vm389_vm1, %v297_v30 }
  0x20   :  { %300 = vmatprep.subr.bf16.mxu0 %v349_v3 }
  0x27   :  { %303 = vmatpush3.bf16.xpose.msk.msra.mxu0 %vm389_vm1, %v301_v37 }
  0x28   :  { %304 = vmatprep.subr.bf16.mxu0 %v349_v3 }
  0x2f   :  { %307 = vmatpush3.bf16.xpose.msk.msra.mxu0 %vm389_vm1, %v305_v44 }
  0x30   :  { %308 = vmatprep.subr.bf16.mxu0 %v349_v3 }
  0x37   :  { %311 = vmatpush3.bf16.xpose.msk.msra.mxu0 %vm389_vm1, %v309_v51 }
  0x38   :  { %312 = vmatprep.subr.bf16.mxu0 %v349_v3 }
  0x3f   :  { %315 = vmatpush3.bf16.xpose.msk.msra.mxu0 %vm389_vm1, %v313_v58 }
  0x46   :  { %282 = vmatmul.mubr.msk.f32.vlgmr.msra.gmra.mrb[0].mxu0 %vm70_vm0, %v352_v59 }
 0x119   :  { %v188_v61 = vpop.f32.mrb[0].mxu0 }
 0x11a   :  { %v189_v62 = vadd.f32 %v213_v60, %v188_v61  ;;  %v283_v63 = vpop.f32.mrb[1].mxu0 }
 0x11c   :  { %v231_v0 = vmul.f32 -1.442695, %v189_v62 }
 0x11e   :  { %321 = vpow2.f32 %v231_v0 }
 0x128   :  { %v322_v1 = vpop.eup %321 }
 0x129   :  { %v195_v2 = vadd.f32 1.0, %v322_v1 }
 0x12b   :  { %323 = vrcp.f32 %v195_v2 }
 0x135   :  { %v324_v3 = vpop.eup %323 }
 0x136   :  { %198 = vst [vmem:[#allocation2] sm:$0xff] %v324_v3 }
 0x137   :  { %336 = shalt.err (!%p333_p4)
}
 0x138   :  { %s337_s26 = scalar_lea.hbm %s519_s3, 128 }
 0x139   :  { %p338_p5 = scmp.ne.s32.totalorder %s519_s3, %s337_s26  ;;  %p341_p6 = scmp.lt.u32.totalorder %s337_s26, %s519_s3 }
 0x13b   :  { %p343_p7 = pnand %p341_p6, %p338_p5 }
 0x13d   :  { %346 = shalt.err (!%p343_p7)
}
 0x13e   :  { %208 = dma.vmem_to_hbm [thread:$0]  %s206_s23, 128, %s519_s3, [#allocation3]  }
 0x13f   :  { %347 = dma.done.wait [#allocation3], 128  }
 0x140   :  { %348 = vsyncadd [#allocation3], 4294967168 }
 0x141   :  { %212 = vsyncpa [#allocation3], 1 }

</bundles_post_ra>
